<compile_context>
chip_gen: v7x
topology: tpu7x:2x2x1
jax: 0.10.0
libtpu: 0.0.40
codegen_flags: <defaults>
</compile_context>

<pallas_src>
import functools
import math

import numpy as np

import jax
import jax.numpy as jnp
from jax.experimental import pallas as pl
from jax.experimental.pallas import tpu as pltpu


# Padded sizes: lane-dense (multiple of 128) on every matmul axis.
NPAD = 128   # padded node axis (lane axis of A, sublane axis of X / out)
FPAD = 128   # padded feature axis (lane axis of X / W / out)


# ----------------------------------------------------------------------------
# Pallas kernel: one fused GCNConv  (X@W  ->  A_hat@H  ->  optional ReLU)
# ----------------------------------------------------------------------------
def _gcn_conv_kernel(a_ref, x_ref, w_ref, o_ref, *, apply_relu):
    # a_ref: [1, NPAD, NPAD] bf16  normalized adjacency + folded bias-pick column
    # x_ref: [1, NPAD, FPAD] bf16  features           + folded bias-indicator row
    # w_ref: [FPAD, FPAD]    bf16  weights            + folded bias row
    # o_ref: [1, NPAD, FPAD] f32
    h = jnp.dot(x_ref[0], w_ref[...], preferred_element_type=jnp.float32)
    z = jnp.dot(a_ref[0], h.astype(jnp.bfloat16),
                preferred_element_type=jnp.float32)
    if apply_relu:
        z = jnp.maximum(z, 0.0)            # elementwise stays f32 (v5e-friendly)
    o_ref[0] = z


def _pallas_gcn_conv(a_pad, x_pad, w_pad, *, apply_relu):
    bsz = a_pad.shape[0]
    flops = 2 * bsz * (NPAD * FPAD * FPAD + NPAD * NPAD * FPAD)
    bytes_accessed = 2 * (a_pad.size + x_pad.size + w_pad.size) \
        + 4 * bsz * NPAD * FPAD
    return pl.pallas_call(
        functools.partial(_gcn_conv_kernel, apply_relu=apply_relu),
        out_shape=jax.ShapeDtypeStruct((bsz, NPAD, FPAD), jnp.float32),
        grid_spec=pltpu.PrefetchScalarGridSpec(
            num_scalar_prefetch=0,
            grid=(bsz,),                                   # batch of graphs
            in_specs=[
                pl.BlockSpec((1, NPAD, NPAD), lambda b: (b, 0, 0)),
                pl.BlockSpec((1, NPAD, FPAD), lambda b: (b, 0, 0)),
                pl.BlockSpec((FPAD, FPAD), lambda b: (0, 0)),   # shared weights
            ],
            out_specs=pl.BlockSpec((1, NPAD, FPAD), lambda b: (b, 0, 0)),
        ),
        compiler_params=pltpu.CompilerParams(
            dimension_semantics=("parallel",)),            # shard batch on 2 TCs
        cost_estimate=pl.CostEstimate(
            flops=flops, transcendentals=0, bytes_accessed=bytes_accessed),
    )(a_pad, x_pad, w_pad)


def gcn_conv_pallas(a_hat, x, w, bvec, *, apply_relu):
    """GCNConv on dense normalized adjacency, bias folded into the matmuls.

    a_hat: [B, n, n] f32   x: [B, n, f_in] f32   w: [f_in, f_out]   bvec: [f_out]
    returns [B, n, f_out] f32
    """
    bsz, n, _ = a_hat.shape
    f_in, f_out = w.shape
    assert n < NPAD and f_in < FPAD and f_out <= FPAD

    a_pad = jnp.zeros((bsz, NPAD, NPAD), jnp.float32)
    a_pad = a_pad.at[:, :n, :n].set(a_hat)
    a_pad = a_pad.at[:, :n, n].set(1.0)        # picks the bias row of H

    x_pad = jnp.zeros((bsz, NPAD, FPAD), jnp.float32)
    x_pad = x_pad.at[:, :n, :f_in].set(x)
    x_pad = x_pad.at[:, n, f_in].set(1.0)      # indicator -> H[n, :] == bias

    w_pad = jnp.zeros((FPAD, FPAD), jnp.float32)
    w_pad = w_pad.at[:f_in, :f_out].set(w)
    w_pad = w_pad.at[f_in, :f_out].set(bvec)   # folded bias row

    out = _pallas_gcn_conv(a_pad.astype(jnp.bfloat16),
                           x_pad.astype(jnp.bfloat16),
                           w_pad.astype(jnp.bfloat16),
                           apply_relu=apply_relu)
    return out[:, :n, :f_out]


def gcn_conv_reference(a_hat, x, w, bvec, *, apply_relu):
    """Pure-JAX reference with the same bf16-in / f32-accumulate policy."""
    h = jnp.matmul(x.astype(jnp.bfloat16), w.astype(jnp.bfloat16),
                   preferred_element_type=jnp.float32)
    z = jnp.matmul(a_hat.astype(jnp.bfloat16), h.astype(jnp.bfloat16),
                   preferred_element_type=jnp.float32) + bvec
    if apply_relu:
        z = jnp.maximum(z, 0.0)
    return z


# ----------------------------------------------------------------------------
# Dense graph plumbing (JAX glue around the Pallas conv calls)
# ----------------------------------------------------------------------------
def gcn_norm_dense(a, improved=True):
    """PyG gcn_norm on a dense weighted adjacency (no self loops on input)."""
    fill = 2.0 if improved else 1.0
    n = a.shape[-1]
    eye = jnp.eye(n, dtype=a.dtype)
    diag = jnp.sum(a * eye, axis=-1)
    new_diag = jnp.where(diag != 0.0, diag, fill)     # add_remaining_self_loops
    a_sl = a * (1.0 - eye) + new_diag[..., :, None] * eye
    deg = a_sl.sum(axis=-1)
    dinv = jnp.where(deg > 0.0, jax.lax.rsqrt(deg), 0.0)
    return a_sl * dinv[..., :, None] * dinv[..., None, :]


def augment_adj_dense(a):
    """remove_self_loops -> add_self_loops(1) -> A@A -> remove_self_loops."""
    n = a.shape[-1]
    eye = jnp.eye(n, dtype=a.dtype)
    a1 = a * (1.0 - eye) + eye
    a2 = jnp.matmul(a1, a1)
    return a2 * (1.0 - eye)


def topk_pool(x, a, p, ratio, fixed_perm=None):
    """TopKPooling: score = tanh(x.p/|p|), keep top ceil(ratio*n) nodes."""
    # TODO(synk): the top-k sort/select and perm gather are data-dependent and
    # have no clean Pallas TPU equivalent; kept in tiny JAX glue.
    n = x.shape[1]
    k = int(math.ceil(ratio * n))
    score = jnp.tanh(jnp.einsum("bnf,f->bn", x, p) / jnp.linalg.norm(p))
    if fixed_perm is None:
        _, perm = jax.lax.top_k(score, k)                       # [B, k]
    else:
        perm = fixed_perm
    sel = jnp.take_along_axis(score, perm, axis=1)              # [B, k]
    x_p = jnp.take_along_axis(x, perm[:, :, None], axis=1) * sel[:, :, None]
    a_rows = jnp.take_along_axis(a, perm[:, :, None], axis=1)   # [B, k, n]
    a_p = jnp.take_along_axis(a_rows, perm[:, None, :], axis=2)  # [B, k, k]
    return x_p, a_p, perm


def unpool(x_small, perm, n_big):
    bsz, _, f = x_small.shape
    up = jnp.zeros((bsz, n_big, f), x_small.dtype)
    return up.at[jnp.arange(bsz)[:, None], perm].set(x_small)


# ----------------------------------------------------------------------------
# GraphUNet forward (sum_res=True, act=relu, pool_ratio=0.5)
# ----------------------------------------------------------------------------
def graph_unet_forward(params, x, adj, *, conv_fn, pool_ratio=0.5,
                       fixed_perms=None):
    depth = len(params["pool_p"])
    a = adj
    h = conv_fn(gcn_norm_dense(a), x, params["down_w"][0], params["down_b"][0],
                apply_relu=True)
    xs, adjs, perms = [h], [a], []

    for i in range(1, depth + 1):
        a_aug = augment_adj_dense(a)
        fp = None if fixed_perms is None else fixed_perms[i - 1]
        h, a, perm = topk_pool(h, a_aug, params["pool_p"][i - 1], pool_ratio, fp)
        h = conv_fn(gcn_norm_dense(a), h, params["down_w"][i],
                    params["down_b"][i], apply_relu=True)
        if i < depth:
            xs.append(h)
            adjs.append(a)
        perms.append(perm)

    for i in range(depth):
        j = depth - 1 - i
        res, a_j, perm = xs[j], adjs[j], perms[j]
        h = res + unpool(h, perm, res.shape[1])            # sum_res=True
        h = conv_fn(gcn_norm_dense(a_j), h, params["up_w"][i],
                    params["up_b"][i], apply_relu=(i < depth - 1))
    return h, tuple(perms)


# ----------------------------------------------------------------------------
# Demo / self-test
# ----------------------------------------------------------------------------
def glorot(key, shape):
    fan_in, fan_out = shape
    lim = (6.0 / (fan_in + fan_out)) ** 0.5
    return jax.random.uniform(key, shape, jnp.float32, -lim, lim)


if __name__ == "__main__":
    B, N0, E = 2, 32, 96          # batch of graphs, nodes/graph, edges/graph
    F_IN, HIDDEN, F_OUT, DEPTH = 16, 32, 8, 2

    key = jax.random.PRNGKey(0)
    keys = jax.random.split(key, 8)

    x = jax.random.normal(keys[0], (B, N0, F_IN), jnp.float32)
    src = jax.random.randint(keys[1], (B, E), 0, N0)
    off = jax.random.randint(keys[2], (B, E), 1, N0)
    dst = (src + off) % N0                                 # no self loops
    edge_index = jnp.stack([src, dst], axis=1).astype(jnp.int32)   # [B, 2, E]
    edge_weight = jnp.ones((B, E), jnp.float32)

    # dense weighted adjacency A[dst, src] += w  (duplicate edges summed)
    adj = jax.vmap(
        lambda ei, ew: jnp.zeros((N0, N0), jnp.float32).at[ei[1], ei[0]].add(ew)
    )(edge_index, edge_weight)

    # Parameters (glorot weights; small bf16-exact biases to exercise the fold;
    # PyG's default bias init is zeros, which is a subset of this).
    def conv_params(k, fi, fo):
        kw, kb = jax.random.split(k)
        w = glorot(kw, (fi, fo))
        b = (0.1 * jax.random.normal(kb, (fo,), jnp.float32))
        b = b.astype(jnp.bfloat16).astype(jnp.float32)
        return w, b

    down_dims = [(F_IN, HIDDEN)] + [(HIDDEN, HIDDEN)] * DEPTH
    up_dims = [(HIDDEN, HIDDEN)] * (DEPTH - 1) + [(HIDDEN, F_OUT)]
    kd = jax.random.split(keys[3], len(down_dims))
    ku = jax.random.split(keys[4], len(up_dims))
    kp = jax.random.split(keys[5], DEPTH)
    down = [conv_params(k, fi, fo) for k, (fi, fo) in zip(kd, down_dims)]
    up = [conv_params(k, fi, fo) for k, (fi, fo) in zip(ku, up_dims)]
    bound = 1.0 / (HIDDEN ** 0.5)
    pool_p = [jax.random.uniform(k, (HIDDEN,), jnp.float32, -bound, bound)
              for k in kp]

    params = {
        "down_w": tuple(w for w, _ in down), "down_b": tuple(b for _, b in down),
        "up_w": tuple(w for w, _ in up), "up_b": tuple(b for _, b in up),
        "pool_p": tuple(pool_p),
    }

    pallas_fwd = jax.jit(functools.partial(graph_unet_forward,
                                           conv_fn=gcn_conv_pallas))
    out, perms = pallas_fwd(params, x, adj)
    out = jax.block_until_ready(out)

    assert out.shape == (B, N0, F_OUT)
    assert bool(jnp.all(jnp.isfinite(out)))

    # Pure-JAX reference (same bf16/f32 policy, same pooling perms) for parity.
    ref_fwd = jax.jit(functools.partial(graph_unet_forward,
                                        conv_fn=gcn_conv_reference))
    ref, _ = ref_fwd(params, x, adj, fixed_perms=perms)
    ref = jax.block_until_ready(ref)
    np.testing.assert_allclose(np.asarray(out), np.asarray(ref),
                               atol=5e-2, rtol=5e-2)

    print("KERNEL_OK")
</pallas_src>

<mosaic_0001>
module attributes {stable_mosaic.version = 11 : i64} {
  func.func @_gcn_conv_kernel(%arg0: i32, %arg1: memref<1x128x128xbf16, #tpu.memory_space<vmem>>, %arg2: memref<1x128x128xbf16, #tpu.memory_space<vmem>>, %arg3: memref<128x128xbf16, #tpu.memory_space<vmem>>, %arg4: memref<1x128x128xf32, #tpu.memory_space<vmem>>) attributes {dimension_semantics = [#tpu.dimension_semantics<parallel>], iteration_bounds = array<i64: 2>, scalar_prefetch = 0 : i64, scratch_operands = 0 : i64, tpu.core_type = #tpu.core_type<tc>, window_params = [{transform_indices = @transform_0, window_bounds = array<i64: 1, 128, 128>}, {transform_indices = @transform_1, window_bounds = array<i64: 1, 128, 128>}, {pipeline_mode = #tpu.pipeline_mode<synchronous>, transform_indices = @transform_2, window_bounds = array<i64: 128, 128>}, {transform_indices = @transform_3, window_bounds = array<i64: 1, 128, 128>}]} {
    %c0 = arith.constant 0 : index
    %c0_0 = arith.constant 0 : index
    %c0_1 = arith.constant 0 : index
    %0 = vector.load %arg2[%c0, %c0_0, %c0_1] : memref<1x128x128xbf16, #tpu.memory_space<vmem>>, vector<1x128x128xbf16>
    %1 = vector.shape_cast %0 : vector<1x128x128xbf16> to vector<128x128xbf16>
    %c0_2 = arith.constant 0 : index
    %c0_3 = arith.constant 0 : index
    %2 = vector.load %arg3[%c0_2, %c0_3] : memref<128x128xbf16, #tpu.memory_space<vmem>>, vector<128x128xbf16>
    %cst = arith.constant dense<0.000000e+00> : vector<128x128xf32>
    %3 = tpu.matmul %1, %2, %cst {dimension_numbers = #tpu.dot_dimension_numbers<[1], [0], [0], [1], [0, 0, 1, 1], [], []>} : vector<128x128xbf16>, vector<128x128xbf16>, vector<128x128xf32> -> vector<128x128xf32>
    %c0_4 = arith.constant 0 : index
    %c0_5 = arith.constant 0 : index
    %c0_6 = arith.constant 0 : index
    %4 = vector.load %arg1[%c0_4, %c0_5, %c0_6] : memref<1x128x128xbf16, #tpu.memory_space<vmem>>, vector<1x128x128xbf16>
    %5 = vector.shape_cast %4 : vector<1x128x128xbf16> to vector<128x128xbf16>
    %6 = arith.truncf %3 : vector<128x128xf32> to vector<128x128xbf16>
    %cst_7 = arith.constant dense<0.000000e+00> : vector<128x128xf32>
    %7 = tpu.matmul %5, %6, %cst_7 {dimension_numbers = #tpu.dot_dimension_numbers<[1], [0], [0], [1], [0, 0, 1, 1], [], []>} : vector<128x128xbf16>, vector<128x128xbf16>, vector<128x128xf32> -> vector<128x128xf32>
    %cst_8 = arith.constant 0.000000e+00 : f32
    %8 = vector.broadcast %cst_8 : f32 to vector<128x128xf32>
    %9 = arith.maximumf %7, %8 : vector<128x128xf32>
    %c0_9 = arith.constant 0 : index
    %c0_10 = arith.constant 0 : index
    %c0_11 = arith.constant 0 : index
    %10 = vector.load %arg4[%c0_9, %c0_10, %c0_11] : memref<1x128x128xf32, #tpu.memory_space<vmem>>, vector<1x128x128xf32>
    %11 = vector.shape_cast %10 : vector<1x128x128xf32> to vector<128x128xf32>
    %12 = vector.shape_cast %9 : vector<128x128xf32> to vector<1x128x128xf32>
    tpu.vector_store %arg4[%c0_9, %c0_10, %c0_11], %12 {strides = array<i32>} : memref<1x128x128xf32, #tpu.memory_space<vmem>>, vector<1x128x128xf32>,
    return
  }
  func.func @transform_0(%arg0: i32) -> (i32, i32, i32) {
    %c0_i32 = arith.constant 0 : i32
    %c0_i32_0 = arith.constant 0 : i32
    %c0_i32_1 = arith.constant 0 : i32
    return %arg0, %c0_i32, %c0_i32_0 : i32, i32, i32
  }
  func.func @transform_1(%arg0: i32) -> (i32, i32, i32) {
    %c0_i32 = arith.constant 0 : i32
    %c0_i32_0 = arith.constant 0 : i32
    %c0_i32_1 = arith.constant 0 : i32
    return %arg0, %c0_i32, %c0_i32_0 : i32, i32, i32
  }
  func.func @transform_2(%arg0: i32) -> (i32, i32) {
    %c0_i32 = arith.constant 0 : i32
    %c0_i32_0 = arith.constant 0 : i32
    %c0_i32_1 = arith.constant 0 : i32
    return %c0_i32, %c0_i32_0 : i32, i32
  }
  func.func @transform_3(%arg0: i32) -> (i32, i32, i32) {
    %c0_i32 = arith.constant 0 : i32
    %c0_i32_0 = arith.constant 0 : i32
    %c0_i32_1 = arith.constant 0 : i32
    return %arg0, %c0_i32, %c0_i32_0 : i32, i32, i32
  }
}

module attributes {stable_mosaic.version = 11 : i64} {
  func.func @_gcn_conv_kernel(%arg0: i32, %arg1: memref<1x128x128xbf16, #tpu.memory_space<vmem>>, %arg2: memref<1x128x128xbf16, #tpu.memory_space<vmem>>, %arg3: memref<128x128xbf16, #tpu.memory_space<vmem>>, %arg4: memref<1x128x128xf32, #tpu.memory_space<vmem>>) attributes {dimension_semantics = [#tpu.dimension_semantics<parallel>], iteration_bounds = array<i64: 2>, scalar_prefetch = 0 : i64, scratch_operands = 0 : i64, tpu.core_type = #tpu.core_type<tc>, window_params = [{transform_indices = @transform_0, window_bounds = array<i64: 1, 128, 128>}, {transform_indices = @transform_1, window_bounds = array<i64: 1, 128, 128>}, {pipeline_mode = #tpu.pipeline_mode<synchronous>, transform_indices = @transform_2, window_bounds = array<i64: 128, 128>}, {transform_indices = @transform_3, window_bounds = array<i64: 1, 128, 128>}]} {
    %c0 = arith.constant 0 : index
    %c0_0 = arith.constant 0 : index
    %c0_1 = arith.constant 0 : index
    %0 = vector.load %arg2[%c0, %c0_0, %c0_1] : memref<1x128x128xbf16, #tpu.memory_space<vmem>>, vector<1x128x128xbf16>
    %1 = vector.shape_cast %0 : vector<1x128x128xbf16> to vector<128x128xbf16>
    %c0_2 = arith.constant 0 : index
    %c0_3 = arith.constant 0 : index
    %2 = vector.load %arg3[%c0_2, %c0_3] : memref<128x128xbf16, #tpu.memory_space<vmem>>, vector<128x128xbf16>
    %cst = arith.constant dense<0.000000e+00> : vector<128x128xf32>
    %3 = tpu.matmul %1, %2, %cst {dimension_numbers = #tpu.dot_dimension_numbers<[1], [0], [0], [1], [0, 0, 1, 1], [], []>} : vector<128x128xbf16>, vector<128x128xbf16>, vector<128x128xf32> -> vector<128x128xf32>
    %c0_4 = arith.constant 0 : index
    %c0_5 = arith.constant 0 : index
    %c0_6 = arith.constant 0 : index
    %4 = vector.load %arg1[%c0_4, %c0_5, %c0_6] : memref<1x128x128xbf16, #tpu.memory_space<vmem>>, vector<1x128x128xbf16>
    %5 = vector.shape_cast %4 : vector<1x128x128xbf16> to vector<128x128xbf16>
    %6 = arith.truncf %3 : vector<128x128xf32> to vector<128x128xbf16>
    %cst_7 = arith.constant dense<0.000000e+00> : vector<128x128xf32>
    %7 = tpu.matmul %5, %6, %cst_7 {dimension_numbers = #tpu.dot_dimension_numbers<[1], [0], [0], [1], [0, 0, 1, 1], [], []>} : vector<128x128xbf16>, vector<128x128xbf16>, vector<128x128xf32> -> vector<128x128xf32>
    %c0_8 = arith.constant 0 : index
    %c0_9 = arith.constant 0 : index
    %c0_10 = arith.constant 0 : index
    %8 = vector.load %arg4[%c0_8, %c0_9, %c0_10] : memref<1x128x128xf32, #tpu.memory_space<vmem>>, vector<1x128x128xf32>
    %9 = vector.shape_cast %8 : vector<1x128x128xf32> to vector<128x128xf32>
    %10 = vector.shape_cast %7 : vector<128x128xf32> to vector<1x128x128xf32>
    tpu.vector_store %arg4[%c0_8, %c0_9, %c0_10], %10 {strides = array<i32>} : memref<1x128x128xf32, #tpu.memory_space<vmem>>, vector<1x128x128xf32>,
    return
  }
  func.func @transform_0(%arg0: i32) -> (i32, i32, i32) {
    %c0_i32 = arith.constant 0 : i32
    %c0_i32_0 = arith.constant 0 : i32
    %c0_i32_1 = arith.constant 0 : i32
    return %arg0, %c0_i32, %c0_i32_0 : i32, i32, i32
  }
  func.func @transform_1(%arg0: i32) -> (i32, i32, i32) {
    %c0_i32 = arith.constant 0 : i32
    %c0_i32_0 = arith.constant 0 : i32
    %c0_i32_1 = arith.constant 0 : i32
    return %arg0, %c0_i32, %c0_i32_0 : i32, i32, i32
  }
  func.func @transform_2(%arg0: i32) -> (i32, i32) {
    %c0_i32 = arith.constant 0 : i32
    %c0_i32_0 = arith.constant 0 : i32
    %c0_i32_1 = arith.constant 0 : i32
    return %c0_i32, %c0_i32_0 : i32, i32
  }
  func.func @transform_3(%arg0: i32) -> (i32, i32, i32) {
    %c0_i32 = arith.constant 0 : i32
    %c0_i32_0 = arith.constant 0 : i32
    %c0_i32_1 = arith.constant 0 : i32
    return %arg0, %c0_i32, %c0_i32_0 : i32, i32, i32
  }
}

</mosaic_0001>

<bundles_post_ra>
// kernel: graph_unet_forward.5
= control target key start
LH: loop header
LB: loop body
LE: loop exit
PB: predicated region body
PF: predicated region fallthrough
CT: control target
= control target key end

     0   :  { %s881_s12 = smov 0   ;;  %s971_s0 = inlined_call_operand.vmem [shape: bf16[2,128,128], index: 0, kind: input, shape index: {}]   ;;  %s972_s1 = inlined_call_operand.vmem [shape: bf16[2,128,128], index: 1, kind: input, shape index: {}]   ;;  %s973_s2 = inlined_call_operand.vmem [shape: bf16[128,128], index: 2, kind: input, shape index: {}]   ;;  %s974_s3 = inlined_call_operand.vmem [shape: f32[2,128,128], index: 3, kind: output, shape index: {}]  }
   0x1 LB: > { %s685_s13 = sadd.s32 4294967295, %s859_s12   ;;  %p689_p0 = scmp.ge.s32.totalorder %s859_s12, 1  ;;  %s859_s12 = sphi %s881_s12, %s13_s12  }
   0x2   : > { %p147_p1 = scmp.lt.s32.totalorder %s859_s12, 3 }
   0x4   : > { %p148_p2 = pnand %p689_p0, %p147_p1 }
   0x5   : > { %v829_v0 = vld [vmem:[%s973_s2] sm:$0xff] (!%p148_p2)   ;;  %p176_p3 = scmp.lt.s32.totalorder (!%p148_p2), %s685_s13, 1  ;;  %v830_v1 = vld [vmem:[%s973_s2 + $0x8] sm:$0xff] (!%p148_p2)   ;;  %v831_v2 = vld [vmem:[%s973_s2 + $0x10] sm:$0xff] (!%p148_p2)  }
   0x6   : > { %151 = sbr.rel (%p148_p2) target bundleno = 529 (0x211), region = 32  ;;  %757 = vmatprep.subr.bf16.mxu0 (!%p148_p2), %v829_v0  ;;  %v832_v3 = vld [vmem:[%s973_s2 + $0x18] sm:$0xff] (!%p148_p2)   ;;  %v833_v5 = vld [vmem:[%s973_s2 + $0x20] sm:$0xff] (!%p148_p2)   ;;  %v834_v6 = vld [vmem:[%s973_s2 + $0x28] sm:$0xff] (!%p148_p2)  }
   0x7   : > { %758 = vmatpush3.bf16.msra.mxu0 (!%p148_p2), %v829_v0  ;;  %v835_v7 = vld [vmem:[%s973_s2 + $0x30] sm:$0xff] (!%p148_p2)   ;;  %v836_v8 = vld [vmem:[%s973_s2 + $0x38] sm:$0xff] (!%p148_p2)  }
   0x8   : > { %759 = vmatprep.subr.bf16.mxu0 (!%p148_p2), %v830_v1 }
   0xb   : > { %760 = vmatpush3.bf16.msra.mxu0 (!%p148_p2), %v830_v1 }
   0xc   : > { %761 = vmatprep.subr.bf16.mxu0 (!%p148_p2), %v831_v2 }
   0xd   : > { %s976_s13 = smov (!%p176_p3, %s685_s13), 1 }
   0xe   : > { %s722_s20 = sshll.u32 %s976_s13, 6  ;;  %s724_s10 = sshll.u32 %s976_s13, 7 }
   0xf   : > { %s906_s23 = scalar_lea.vmem %s972_s1, %s722_s20  ;;  %762 = vmatpush3.bf16.msra.mxu0 %v831_v2  ;;  %s936_s9 = scalar_lea.vmem %s971_s0, %s722_s20 }
  0x10   : > { %v837_v4 = vld [vmem:[%s906_s23] sm:$0xff]   ;;  %763 = vmatprep.subr.bf16.mxu0 %v832_v3  ;;  %v838_v9 = vld [vmem:[%s906_s23 + $0x8] sm:$0xff]   ;;  %v839_v10 = vld [vmem:[%s906_s23 + $0x10] sm:$0xff]   ;;  %s950_s15 = scalar_lea.vmem %s974_s3, %s724_s10 }
  0x11   : > { %773 = vmatprep.mubr.bf16.mxu0 %v837_v4  ;;  %v840_v11 = vld [vmem:[%s906_s23 + $0x18] sm:$0xff]   ;;  %v841_v12 = vld [vmem:[%s906_s23 + $0x20] sm:$0xff]   ;;  %v842_v13 = vld [vmem:[%s906_s23 + $0x28] sm:$0xff]  }
  0x12   : > { %v843_v14 = vld [vmem:[%s906_s23 + $0x30] sm:$0xff]   ;;  %v844_v15 = vld [vmem:[%s906_s23 + $0x38] sm:$0xff]   ;;  %v845_v16 = vld [vmem:[%s936_s9] sm:$0xff]  }
  0x13   : > { %764 = vmatpush3.bf16.msra.mxu0 %v832_v3  ;;  %805 = vmatprep.mubr.bf16.mxu1 %v845_v16  ;;  %v846_v41 = vld [vmem:[%s936_s9 + $0x8] sm:$0xff]   ;;  %v847_v42 = vld [vmem:[%s936_s9 + $0x10] sm:$0xff]   ;;  %v848_v43 = vld [vmem:[%s936_s9 + $0x18] sm:$0xff]  }
  0x14   : > { %765 = vmatprep.subr.bf16.mxu0 %v833_v5  ;;  %v849_v44 = vld [vmem:[%s936_s9 + $0x20] sm:$0xff]   ;;  %v850_v45 = vld [vmem:[%s936_s9 + $0x28] sm:$0xff]   ;;  %v851_v46 = vld [vmem:[%s936_s9 + $0x30] sm:$0xff]  }
  0x15   : > { %v852_v47 = vld [vmem:[%s936_s9 + $0x38] sm:$0xff]  }
  0x17   : > { %766 = vmatpush3.bf16.msra.mxu0 %v833_v5 }
  0x18   : > { %767 = vmatprep.subr.bf16.mxu0 %v834_v6 }
  0x1b   : > { %768 = vmatpush3.bf16.msra.mxu0 %v834_v6 }
  0x1c   : > { %769 = vmatprep.subr.bf16.mxu0 %v835_v7 }
  0x1f   : > { %770 = vmatpush3.bf16.msra.mxu0 %v835_v7 }
  0x20   : > { %771 = vmatprep.subr.bf16.mxu0 %v836_v8 }
  0x23   : > { %772 = vmatpush3.bf16.msra.mxu0 %v836_v8 }
  0x26   : > { %774 = vmatmul.mubr.bf16.vlgmr.msra.gmra.mrb[0].mxu0 %v838_v9 }
  0x27   : > { %777 = vmatprep.mubr.bf16.mxu0 %v839_v10 }
  0x2e   : > { %778 = vmatmul.mubr.bf16.gmra.mrb[4].mxu0 %v840_v11 }
  0x2f   : > { %781 = vmatprep.mubr.bf16.mxu0 %v841_v12 }
  0x36   : > { %782 = vmatmul.mubr.bf16.gmra.mrb[8].mxu0 %v842_v13 }
  0x37   : > { %785 = vmatprep.mubr.bf16.mxu0 %v843_v14 }
  0x3e   : > { %786 = vmatmul.mubr.bf16.gmra.mrb[12].mxu0 %v844_v15 }
  0xf9   : > { %v775_v17 = vpop.f32.mrb[0].mxu0 }
  0xfa   : > { %v354_v18 = vpop.f32.mrb[1].mxu0 }
  0xfb   : > { %v776_v19 = vpop.f32.mrb[2].mxu0 }
  0xfc   : > { %v434_v20 = vpack.c.bf16 %v776_v19, %v775_v17  ;;  %v357_v21 = vpop.f32.mrb[3].mxu0 }
  0xfd   : > { %v433_v22 = vpack.c.bf16 %v357_v21, %v354_v18 }
  0xff   : > { %789 = vmatprep.subr.bf16.mxu1 %v433_v22 }
 0x100   : > { %790 = vmatpush3.bf16.msra.mxu1 %v433_v22 }
 0x101   : > { %v779_v23 = vpop.f32.mrb[4].mxu0  ;;  %791 = vmatprep.subr.bf16.mxu1 %v434_v20 }
 0x102   : > { %v370_v24 = vpop.f32.mrb[5].mxu0 }
 0x103   : > { %v780_v25 = vpop.f32.mrb[6].mxu0 }
 0x104   : > { %v436_v26 = vpack.c.bf16 %v780_v25, %v779_v23  ;;  %v373_v27 = vpop.f32.mrb[7].mxu0  ;;  %792 = vmatpush3.bf16.msra.mxu1 %v434_v20 }
 0x105   : > { %v435_v28 = vpack.c.bf16 %v373_v27, %v370_v24 }
 0x107   : > { %793 = vmatprep.subr.bf16.mxu1 %v435_v28 }
 0x108   : > { %794 = vmatpush3.bf16.msra.mxu1 %v435_v28 }
 0x109   : > { %v783_v29 = vpop.f32.mrb[8].mxu0  ;;  %795 = vmatprep.subr.bf16.mxu1 %v436_v26 }
 0x10a   : > { %v386_v30 = vpop.f32.mrb[9].mxu0 }
 0x10b   : > { %v784_v31 = vpop.f32.mrb[10].mxu0 }
 0x10c   : > { %v438_v32 = vpack.c.bf16 %v784_v31, %v783_v29  ;;  %v389_v33 = vpop.f32.mrb[11].mxu0  ;;  %796 = vmatpush3.bf16.msra.mxu1 %v436_v26 }
 0x10d   : > { %v437_v34 = vpack.c.bf16 %v389_v33, %v386_v30 }
 0x10f   : > { %797 = vmatprep.subr.bf16.mxu1 %v437_v34 }
 0x110   : > { %798 = vmatpush3.bf16.msra.mxu1 %v437_v34 }
 0x111   : > { %v787_v35 = vpop.f32.mrb[12].mxu0  ;;  %799 = vmatprep.subr.bf16.mxu1 %v438_v32 }
 0x112   : > { %v402_v36 = vpop.f32.mrb[13].mxu0 }
 0x113   : > { %v788_v37 = vpop.f32.mrb[14].mxu0 }
 0x114   : > { %v440_v38 = vpack.c.bf16 %v788_v37, %v787_v35  ;;  %v405_v39 = vpop.f32.mrb[15].mxu0  ;;  %800 = vmatpush3.bf16.msra.mxu1 %v438_v32 }
 0x115   : > { %v439_v40 = vpack.c.bf16 %v405_v39, %v402_v36 }
 0x117   : > { %801 = vmatprep.subr.bf16.mxu1 %v439_v40 }
 0x118   : > { %802 = vmatpush3.bf16.msra.mxu1 %v439_v40 }
 0x119   : > { %803 = vmatprep.subr.bf16.mxu1 %v440_v38 }
 0x11c   : > { %804 = vmatpush3.bf16.msra.mxu1 %v440_v38 }
 0x11f   : > { %806 = vmatmul.mubr.bf16.vlgmr.msra.gmra.mrb[0].mxu1 %v846_v41 }
 0x120   : > { %809 = vmatprep.mubr.bf16.mxu1 %v847_v42 }
 0x127   : > { %810 = vmatmul.mubr.bf16.gmra.mrb[4].mxu1 %v848_v43 }
 0x128   : > { %813 = vmatprep.mubr.bf16.mxu1 %v849_v44 }
 0x12f   : > { %814 = vmatmul.mubr.bf16.gmra.mrb[8].mxu1 %v850_v45 }
 0x130   : > { %817 = vmatprep.mubr.bf16.mxu1 %v851_v46 }
 0x137   : > { %818 = vmatmul.mubr.bf16.gmra.mrb[12].mxu1 %v852_v47 }
 0x1f2   : > { %v807_v48 = vpop.f32.mrb[0].mxu1 }
 0x1f3   : > { %v588_v49 = vmax.f32 %v807_v48, 0.0  ;;  %v523_v50 = vpop.f32.mrb[1].mxu1 }
 0x1f4   : > { %v586_v51 = vmax.f32 %v523_v50, 0.0  ;;  %v808_v52 = vpop.f32.mrb[2].mxu1 }
 0x1f5   : > { %604 = vst [vmem:[%s950_s15 + $0x10] sm:$0xff] %v588_v49  ;;  %v589_v53 = vmax.f32 %v808_v52, 0.0  ;;  %v526_v54 = vpop.f32.mrb[3].mxu1 }
 0x1f6   : > { %602 = vst [vmem:[%s950_s15] sm:$0xff] %v586_v51  ;;  %v587_v55 = vmax.f32 %v526_v54, 0.0 }
 0x1f7   : > { %605 = vst [vmem:[%s950_s15 + $0x18] sm:$0xff] %v589_v53 }
 0x1f8   : > { %603 = vst [vmem:[%s950_s15 + $0x8] sm:$0xff] %v587_v55 }
 0x1fa   : > { %v811_v56 = vpop.f32.mrb[4].mxu1 }
 0x1fb   : > { %v592_v57 = vmax.f32 %v811_v56, 0.0  ;;  %v539_v58 = vpop.f32.mrb[5].mxu1 }
 0x1fc   : > { %v590_v59 = vmax.f32 %v539_v58, 0.0  ;;  %v812_v60 = vpop.f32.mrb[6].mxu1 }
 0x1fd   : > { %608 = vst [vmem:[%s950_s15 + $0x30] sm:$0xff] %v592_v57  ;;  %v593_v61 = vmax.f32 %v812_v60, 0.0  ;;  %v542_v62 = vpop.f32.mrb[7].mxu1 }
 0x1fe   : > { %606 = vst [vmem:[%s950_s15 + $0x20] sm:$0xff] %v590_v59  ;;  %v591_v63 = vmax.f32 %v542_v62, 0.0 }
 0x1ff   : > { %609 = vst [vmem:[%s950_s15 + $0x38] sm:$0xff] %v593_v61 }
 0x200   : > { %607 = vst [vmem:[%s950_s15 + $0x28] sm:$0xff] %v591_v63 }
 0x202   : > { %v815_v0 = vpop.f32.mrb[8].mxu1 }
 0x203   : > { %v596_v1 = vmax.f32 %v815_v0, 0.0  ;;  %v555_v2 = vpop.f32.mrb[9].mxu1 }
 0x204   : > { %v594_v3 = vmax.f32 %v555_v2, 0.0  ;;  %v816_v4 = vpop.f32.mrb[10].mxu1 }
 0x205   : > { %612 = vst [vmem:[%s950_s15 + $0x50] sm:$0xff] %v596_v1  ;;  %v597_v5 = vmax.f32 %v816_v4, 0.0  ;;  %v558_v6 = vpop.f32.mrb[11].mxu1 }
 0x206   : > { %610 = vst [vmem:[%s950_s15 + $0x40] sm:$0xff] %v594_v3  ;;  %v595_v7 = vmax.f32 %v558_v6, 0.0 }
 0x207   : > { %613 = vst [vmem:[%s950_s15 + $0x58] sm:$0xff] %v597_v5 }
 0x208   : > { %611 = vst [vmem:[%s950_s15 + $0x48] sm:$0xff] %v595_v7 }
 0x20a   : > { %v819_v8 = vpop.f32.mrb[12].mxu1 }
 0x20b   : > { %v600_v9 = vmax.f32 %v819_v8, 0.0  ;;  %v571_v10 = vpop.f32.mrb[13].mxu1 }
 0x20c   : > { %v598_v11 = vmax.f32 %v571_v10, 0.0  ;;  %v820_v12 = vpop.f32.mrb[14].mxu1 }
 0x20d   : > { %616 = vst [vmem:[%s950_s15 + $0x70] sm:$0xff] %v600_v9  ;;  %v601_v13 = vmax.f32 %v820_v12, 0.0  ;;  %v574_v14 = vpop.f32.mrb[15].mxu1 }
 0x20e   : > { %614 = vst [vmem:[%s950_s15 + $0x60] sm:$0xff] %v598_v11  ;;  %v599_v15 = vmax.f32 %v574_v14, 0.0 }
 0x20f   : > { %617 = vst [vmem:[%s950_s15 + $0x78] sm:$0xff] %v601_v13 }
 0x210   : > { %615 = vst [vmem:[%s950_s15 + $0x68] sm:$0xff] %v599_v15 }
 0x211 PF: > { %s13_s12 = sadd.s32 1, %s859_s12  }
 0x212   : > { %p10_p4 = scmp.ge.s32.totalorder %s13_s12, 4  }
 0x214   :  { %12 = sbr.rel (!%p10_p4) target bundleno = 1 (0x1), region = 65 }

// kernel: graph_unet_forward.9
= control target key start
LH: loop header
LB: loop body
LE: loop exit
PB: predicated region body
PF: predicated region fallthrough
CT: control target
= control target key end

     0   :  { %s865_s12 = smov 0   ;;  %s955_s0 = inlined_call_operand.vmem [shape: bf16[2,128,128], index: 0, kind: input, shape index: {}]   ;;  %s956_s1 = inlined_call_operand.vmem [shape: bf16[2,128,128], index: 1, kind: input, shape index: {}]   ;;  %s957_s2 = inlined_call_operand.vmem [shape: bf16[128,128], index: 2, kind: input, shape index: {}]   ;;  %s958_s3 = inlined_call_operand.vmem [shape: f32[2,128,128], index: 3, kind: output, shape index: {}]  }
   0x1 LB: > { %s669_s13 = sadd.s32 4294967295, %s843_s12   ;;  %p673_p0 = scmp.ge.s32.totalorder %s843_s12, 1  ;;  %s843_s12 = sphi %s865_s12, %s13_s12  }
   0x2   : > { %p147_p1 = scmp.lt.s32.totalorder %s843_s12, 3 }
   0x4   : > { %p148_p2 = pnand %p673_p0, %p147_p1 }
   0x5   : > { %v813_v0 = vld [vmem:[%s957_s2] sm:$0xff] (!%p148_p2)   ;;  %p176_p3 = scmp.lt.s32.totalorder (!%p148_p2), %s669_s13, 1  ;;  %v814_v1 = vld [vmem:[%s957_s2 + $0x8] sm:$0xff] (!%p148_p2)   ;;  %v815_v2 = vld [vmem:[%s957_s2 + $0x10] sm:$0xff] (!%p148_p2)  }
   0x6   : > { %151 = sbr.rel (%p148_p2) target bundleno = 527 (0x20f), region = 32  ;;  %741 = vmatprep.subr.bf16.mxu0 (!%p148_p2), %v813_v0  ;;  %v816_v3 = vld [vmem:[%s957_s2 + $0x18] sm:$0xff] (!%p148_p2)   ;;  %v817_v5 = vld [vmem:[%s957_s2 + $0x20] sm:$0xff] (!%p148_p2)   ;;  %v818_v6 = vld [vmem:[%s957_s2 + $0x28] sm:$0xff] (!%p148_p2)  }
   0x7   : > { %742 = vmatpush3.bf16.msra.mxu0 (!%p148_p2), %v813_v0  ;;  %v819_v7 = vld [vmem:[%s957_s2 + $0x30] sm:$0xff] (!%p148_p2)   ;;  %v820_v8 = vld [vmem:[%s957_s2 + $0x38] sm:$0xff] (!%p148_p2)  }
   0x8   : > { %743 = vmatprep.subr.bf16.mxu0 (!%p148_p2), %v814_v1 }
   0xb   : > { %744 = vmatpush3.bf16.msra.mxu0 (!%p148_p2), %v814_v1 }
   0xc   : > { %745 = vmatprep.subr.bf16.mxu0 (!%p148_p2), %v815_v2 }
   0xd   : > { %s960_s13 = smov (!%p176_p3, %s669_s13), 1 }
   0xe   : > { %s706_s20 = sshll.u32 %s960_s13, 6  ;;  %s708_s10 = sshll.u32 %s960_s13, 7 }
   0xf   : > { %s890_s23 = scalar_lea.vmem %s956_s1, %s706_s20  ;;  %746 = vmatpush3.bf16.msra.mxu0 %v815_v2  ;;  %s920_s9 = scalar_lea.vmem %s955_s0, %s706_s20 }
  0x10   : > { %v821_v4 = vld [vmem:[%s890_s23] sm:$0xff]   ;;  %747 = vmatprep.subr.bf16.mxu0 %v816_v3  ;;  %v822_v9 = vld [vmem:[%s890_s23 + $0x8] sm:$0xff]   ;;  %v823_v10 = vld [vmem:[%s890_s23 + $0x10] sm:$0xff]   ;;  %s934_s15 = scalar_lea.vmem %s958_s3, %s708_s10 }
  0x11   : > { %757 = vmatprep.mubr.bf16.mxu0 %v821_v4  ;;  %v824_v11 = vld [vmem:[%s890_s23 + $0x18] sm:$0xff]   ;;  %v825_v12 = vld [vmem:[%s890_s23 + $0x20] sm:$0xff]   ;;  %v826_v13 = vld [vmem:[%s890_s23 + $0x28] sm:$0xff]  }
  0x12   : > { %v827_v14 = vld [vmem:[%s890_s23 + $0x30] sm:$0xff]   ;;  %v828_v15 = vld [vmem:[%s890_s23 + $0x38] sm:$0xff]   ;;  %v829_v16 = vld [vmem:[%s920_s9] sm:$0xff]  }
  0x13   : > { %748 = vmatpush3.bf16.msra.mxu0 %v816_v3  ;;  %789 = vmatprep.mubr.bf16.mxu1 %v829_v16  ;;  %v830_v41 = vld [vmem:[%s920_s9 + $0x8] sm:$0xff]   ;;  %v831_v42 = vld [vmem:[%s920_s9 + $0x10] sm:$0xff]   ;;  %v832_v43 = vld [vmem:[%s920_s9 + $0x18] sm:$0xff]  }
  0x14   : > { %749 = vmatprep.subr.bf16.mxu0 %v817_v5  ;;  %v833_v44 = vld [vmem:[%s920_s9 + $0x20] sm:$0xff]   ;;  %v834_v45 = vld [vmem:[%s920_s9 + $0x28] sm:$0xff]   ;;  %v835_v46 = vld [vmem:[%s920_s9 + $0x30] sm:$0xff]  }
  0x15   : > { %v836_v47 = vld [vmem:[%s920_s9 + $0x38] sm:$0xff]  }
  0x17   : > { %750 = vmatpush3.bf16.msra.mxu0 %v817_v5 }
  0x18   : > { %751 = vmatprep.subr.bf16.mxu0 %v818_v6 }
  0x1b   : > { %752 = vmatpush3.bf16.msra.mxu0 %v818_v6 }
  0x1c   : > { %753 = vmatprep.subr.bf16.mxu0 %v819_v7 }
  0x1f   : > { %754 = vmatpush3.bf16.msra.mxu0 %v819_v7 }
  0x20   : > { %755 = vmatprep.subr.bf16.mxu0 %v820_v8 }
  0x23   : > { %756 = vmatpush3.bf16.msra.mxu0 %v820_v8 }
  0x26   : > { %758 = vmatmul.mubr.bf16.vlgmr.msra.gmra.mrb[0].mxu0 %v822_v9 }
  0x27   : > { %761 = vmatprep.mubr.bf16.mxu0 %v823_v10 }
  0x2e   : > { %762 = vmatmul.mubr.bf16.gmra.mrb[4].mxu0 %v824_v11 }
  0x2f   : > { %765 = vmatprep.mubr.bf16.mxu0 %v825_v12 }
  0x36   : > { %766 = vmatmul.mubr.bf16.gmra.mrb[8].mxu0 %v826_v13 }
  0x37   : > { %769 = vmatprep.mubr.bf16.mxu0 %v827_v14 }
  0x3e   : > { %770 = vmatmul.mubr.bf16.gmra.mrb[12].mxu0 %v828_v15 }
  0xf9   : > { %v759_v17 = vpop.f32.mrb[0].mxu0 }
  0xfa   : > { %v354_v18 = vpop.f32.mrb[1].mxu0 }
  0xfb   : > { %v760_v19 = vpop.f32.mrb[2].mxu0 }
  0xfc   : > { %v434_v20 = vpack.c.bf16 %v760_v19, %v759_v17  ;;  %v357_v21 = vpop.f32.mrb[3].mxu0 }
  0xfd   : > { %v433_v22 = vpack.c.bf16 %v357_v21, %v354_v18 }
  0xff   : > { %773 = vmatprep.subr.bf16.mxu1 %v433_v22 }
 0x100   : > { %774 = vmatpush3.bf16.msra.mxu1 %v433_v22 }
 0x101   : > { %v763_v23 = vpop.f32.mrb[4].mxu0  ;;  %775 = vmatprep.subr.bf16.mxu1 %v434_v20 }
 0x102   : > { %v370_v24 = vpop.f32.mrb[5].mxu0 }
 0x103   : > { %v764_v25 = vpop.f32.mrb[6].mxu0 }
 0x104   : > { %v436_v26 = vpack.c.bf16 %v764_v25, %v763_v23  ;;  %v373_v27 = vpop.f32.mrb[7].mxu0  ;;  %776 = vmatpush3.bf16.msra.mxu1 %v434_v20 }
 0x105   : > { %v435_v28 = vpack.c.bf16 %v373_v27, %v370_v24 }
 0x107   : > { %777 = vmatprep.subr.bf16.mxu1 %v435_v28 }
 0x108   : > { %778 = vmatpush3.bf16.msra.mxu1 %v435_v28 }
 0x109   : > { %v767_v29 = vpop.f32.mrb[8].mxu0  ;;  %779 = vmatprep.subr.bf16.mxu1 %v436_v26 }
 0x10a   : > { %v386_v30 = vpop.f32.mrb[9].mxu0 }
 0x10b   : > { %v768_v31 = vpop.f32.mrb[10].mxu0 }
 0x10c   : > { %v438_v32 = vpack.c.bf16 %v768_v31, %v767_v29  ;;  %v389_v33 = vpop.f32.mrb[11].mxu0  ;;  %780 = vmatpush3.bf16.msra.mxu1 %v436_v26 }
 0x10d   : > { %v437_v34 = vpack.c.bf16 %v389_v33, %v386_v30 }
 0x10f   : > { %781 = vmatprep.subr.bf16.mxu1 %v437_v34 }
 0x110   : > { %782 = vmatpush3.bf16.msra.mxu1 %v437_v34 }
 0x111   : > { %v771_v35 = vpop.f32.mrb[12].mxu0  ;;  %783 = vmatprep.subr.bf16.mxu1 %v438_v32 }
 0x112   : > { %v402_v36 = vpop.f32.mrb[13].mxu0 }
 0x113   : > { %v772_v37 = vpop.f32.mrb[14].mxu0 }
 0x114   : > { %v440_v38 = vpack.c.bf16 %v772_v37, %v771_v35  ;;  %v405_v39 = vpop.f32.mrb[15].mxu0  ;;  %784 = vmatpush3.bf16.msra.mxu1 %v438_v32 }
 0x115   : > { %v439_v40 = vpack.c.bf16 %v405_v39, %v402_v36 }
 0x117   : > { %785 = vmatprep.subr.bf16.mxu1 %v439_v40 }
 0x118   : > { %786 = vmatpush3.bf16.msra.mxu1 %v439_v40 }
 0x119   : > { %787 = vmatprep.subr.bf16.mxu1 %v440_v38 }
 0x11c   : > { %788 = vmatpush3.bf16.msra.mxu1 %v440_v38 }
 0x11f   : > { %790 = vmatmul.mubr.bf16.vlgmr.msra.gmra.mrb[0].mxu1 %v830_v41 }
 0x120   : > { %793 = vmatprep.mubr.bf16.mxu1 %v831_v42 }
 0x127   : > { %794 = vmatmul.mubr.bf16.gmra.mrb[4].mxu1 %v832_v43 }
 0x128   : > { %797 = vmatprep.mubr.bf16.mxu1 %v833_v44 }
 0x12f   : > { %798 = vmatmul.mubr.bf16.gmra.mrb[8].mxu1 %v834_v45 }
 0x130   : > { %801 = vmatprep.mubr.bf16.mxu1 %v835_v46 }
 0x137   : > { %802 = vmatmul.mubr.bf16.gmra.mrb[12].mxu1 %v836_v47 }
 0x1f2   : > { %v791_v48 = vpop.f32.mrb[0].mxu1 }
 0x1f3   : > { %588 = vst [vmem:[%s934_s15 + $0x10] sm:$0xff] %v791_v48  ;;  %v523_v49 = vpop.f32.mrb[1].mxu1 }
 0x1f4   : > { %586 = vst [vmem:[%s934_s15] sm:$0xff] %v523_v49  ;;  %v792_v50 = vpop.f32.mrb[2].mxu1 }
 0x1f5   : > { %589 = vst [vmem:[%s934_s15 + $0x18] sm:$0xff] %v792_v50  ;;  %v526_v51 = vpop.f32.mrb[3].mxu1 }
 0x1f6   : > { %587 = vst [vmem:[%s934_s15 + $0x8] sm:$0xff] %v526_v51 }
 0x1fa   : > { %v795_v52 = vpop.f32.mrb[4].mxu1 }
 0x1fb   : > { %592 = vst [vmem:[%s934_s15 + $0x30] sm:$0xff] %v795_v52  ;;  %v539_v53 = vpop.f32.mrb[5].mxu1 }
 0x1fc   : > { %590 = vst [vmem:[%s934_s15 + $0x20] sm:$0xff] %v539_v53  ;;  %v796_v54 = vpop.f32.mrb[6].mxu1 }
 0x1fd   : > { %593 = vst [vmem:[%s934_s15 + $0x38] sm:$0xff] %v796_v54  ;;  %v542_v55 = vpop.f32.mrb[7].mxu1 }
 0x1fe   : > { %591 = vst [vmem:[%s934_s15 + $0x28] sm:$0xff] %v542_v55 }
 0x202   : > { %v799_v56 = vpop.f32.mrb[8].mxu1 }
 0x203   : > { %596 = vst [vmem:[%s934_s15 + $0x50] sm:$0xff] %v799_v56  ;;  %v555_v57 = vpop.f32.mrb[9].mxu1 }
 0x204   : > { %594 = vst [vmem:[%s934_s15 + $0x40] sm:$0xff] %v555_v57  ;;  %v800_v58 = vpop.f32.mrb[10].mxu1 }
 0x205   : > { %597 = vst [vmem:[%s934_s15 + $0x58] sm:$0xff] %v800_v58  ;;  %v558_v59 = vpop.f32.mrb[11].mxu1 }
 0x206   : > { %595 = vst [vmem:[%s934_s15 + $0x48] sm:$0xff] %v558_v59 }
 0x20a   : > { %v803_v60 = vpop.f32.mrb[12].mxu1 }
 0x20b   : > { %600 = vst [vmem:[%s934_s15 + $0x70] sm:$0xff] %v803_v60  ;;  %v571_v61 = vpop.f32.mrb[13].mxu1 }
 0x20c   : > { %598 = vst [vmem:[%s934_s15 + $0x60] sm:$0xff] %v571_v61  ;;  %v804_v62 = vpop.f32.mrb[14].mxu1 }
 0x20d   : > { %601 = vst [vmem:[%s934_s15 + $0x78] sm:$0xff] %v804_v62  ;;  %v574_v63 = vpop.f32.mrb[15].mxu1 }
 0x20e   : > { %599 = vst [vmem:[%s934_s15 + $0x68] sm:$0xff] %v574_v63 }
 0x20f PF: > { %s13_s12 = sadd.s32 1, %s843_s12  }
 0x210   : > { %p10_p4 = scmp.ge.s32.totalorder %s13_s12, 4  }
 0x212   :  { %12 = sbr.rel (!%p10_p4) target bundleno = 1 (0x1), region = 65 }

</bundles_post_ra>
